<compile_context>
chip_gen: v6e
topology: v6e:2x2x1
jax: 0.10.0
libtpu: 0.0.40
codegen_flags: <defaults>
</compile_context>

<pallas_src>
import functools

import numpy as np
import jax
import jax.numpy as jnp
from jax import lax
from jax.experimental import pallas as pl
from jax.experimental.pallas import tpu as pltpu


_VMEM = pl.BlockSpec(memory_space=pltpu.MemorySpace.VMEM)
_HIDDEN = 128          # 132 in the torch reference; 128 is MXU/vreg native
_COS_EPS_SQ = 1e-16    # (1e-8)^2 : 1/max(||v||,1e-8) == rsqrt(max(||v||^2, 1e-16))


# ----------------------------------------------------------------------------
# Pallas kernels
# ----------------------------------------------------------------------------
def _mlp(x, w_in_ref, b_in_ref, w_hid_ref, b_hid_ref, w_out_ref, b_out_ref,
         num_hidden):
    """FCBlock body: Linear+ReLU -> num_hidden x (Linear+ReLU) -> Linear+ReLU."""
    h = jnp.maximum(
        jnp.dot(x, w_in_ref[...], preferred_element_type=jnp.float32)
        + b_in_ref[...], 0.0)
    for i in range(num_hidden):   # static unroll (num_hidden is a Python int)
        h = jnp.maximum(
            jnp.dot(h, w_hid_ref[i], preferred_element_type=jnp.float32)
            + b_hid_ref[i], 0.0)
    return jnp.maximum(
        jnp.dot(h, w_out_ref[...], preferred_element_type=jnp.float32)
        + b_out_ref[...], 0.0)


def _key_proj_kernel(x_ref, w_in, b_in, w_hid, b_hid, w_out, b_out,
                     kunit_ref, *, num_hidden):
    """K = FCBlock(token_features); output unit-normalized rows (for cosine)."""
    k = _mlp(x_ref[...], w_in, b_in, w_hid, b_hid, w_out, b_out, num_hidden)
    ksq = jnp.sum(k * k, axis=-1, keepdims=True)                  # [N, 1]
    kunit_ref[...] = k * lax.rsqrt(jnp.maximum(ksq, _COS_EPS_SQ))  # [N, latent]


def _signal_dist_kernel(s_ref, kunit_ref, w_in, b_in, w_hid, b_hid, w_out, b_out,
                        probs_ref, neglog_ref, *, num_hidden):
    """Fused per-node step: signal_proj MLP + cosine + temp-9 softmax/log-softmax."""
    s_lat = _mlp(s_ref[...], w_in, b_in, w_hid, b_hid, w_out, b_out, num_hidden)
    ssq = jnp.sum(s_lat * s_lat, axis=-1, keepdims=True)           # [1, 1]
    s_unit = s_lat * lax.rsqrt(jnp.maximum(ssq, _COS_EPS_SQ))      # [1, latent]
    # cos(K_n, S) for all tokens, lane-dense [1, N]: contract latent dims.
    cos = lax.dot_general(s_unit, kunit_ref[...],
                          (((1,), (1,)), ((), ())),
                          preferred_element_type=jnp.float32)       # [1, N]
    z = 9.0 * cos
    m = jnp.max(z, axis=-1, keepdims=True)
    zs = z - m
    e = jnp.exp(zs)
    se = jnp.sum(e, axis=-1, keepdims=True)
    probs_ref[...] = e * pl.reciprocal(se, approx=True)             # softmax
    neglog_ref[...] = jnp.log(se) - zs                               # -log_softmax


def _repeater_kernel(s_ref, a_ref, w_in_s, w_in_a, b_in, w_hid, b_hid,
                     w_out, b_out, out_ref, *, num_hidden):
    """Batched repeater over all args of a node; split first-layer weights
    replace the host-side concat: relu(s@W_s + a@W_a + b) == relu(cat@W_in + b)."""
    hs = jnp.dot(s_ref[...], w_in_s[...], preferred_element_type=jnp.float32)  # [1, H]
    ha = jnp.dot(a_ref[...], w_in_a[...], preferred_element_type=jnp.float32)  # [A, H]
    h = jnp.maximum(hs + ha + b_in[...], 0.0)
    for i in range(num_hidden):
        h = jnp.maximum(
            jnp.dot(h, w_hid[i], preferred_element_type=jnp.float32)
            + b_hid[i], 0.0)
    out_ref[...] = jnp.maximum(
        jnp.dot(h, w_out[...], preferred_element_type=jnp.float32)
        + b_out[...], 0.0)


# ----------------------------------------------------------------------------
# Jitted wrappers (one compiled executable per shape; <=2 dispatches per node)
# ----------------------------------------------------------------------------
@jax.jit
def key_projection(token_features, params):
    w_in, b_in, w_hid, b_hid, w_out, b_out = params
    n = token_features.shape[0]
    latent = w_out.shape[1]
    kern = functools.partial(_key_proj_kernel, num_hidden=w_hid.shape[0])
    return pl.pallas_call(
        kern,
        out_shape=jax.ShapeDtypeStruct((n, latent), jnp.float32),
        in_specs=[_VMEM] * 7,
        out_specs=_VMEM,
    )(token_features, w_in, b_in, w_hid, b_hid, w_out, b_out)


@jax.jit
def signal_distribution(s, k_unit, params):
    w_in, b_in, w_hid, b_hid, w_out, b_out = params
    n = k_unit.shape[0]
    kern = functools.partial(_signal_dist_kernel, num_hidden=w_hid.shape[0])
    probs, neglog = pl.pallas_call(
        kern,
        out_shape=(jax.ShapeDtypeStruct((1, n), jnp.float32),
                   jax.ShapeDtypeStruct((1, n), jnp.float32)),
        in_specs=[_VMEM] * 8,
        out_specs=(_VMEM, _VMEM),
    )(s, k_unit, w_in, b_in, w_hid, b_hid, w_out, b_out)
    return probs, neglog


@jax.jit
def repeater_signals(s, arg_features, params):
    w_in_s, w_in_a, b_in, w_hid, b_hid, w_out, b_out = params
    a = arg_features.shape[0]
    s_dim = w_out.shape[1]
    kern = functools.partial(_repeater_kernel, num_hidden=w_hid.shape[0])
    out = pl.pallas_call(
        kern,
        out_shape=jax.ShapeDtypeStruct((a, s_dim), jnp.float32),
        in_specs=[_VMEM] * 9,
        out_specs=_VMEM,
    )(s, arg_features, w_in_s, w_in_a, b_in, w_hid, b_hid, w_out, b_out)
    # Split inside the jit so each child gets a ready [1, s_dim] signal with no
    # extra per-child host-side slicing dispatch.
    return tuple(out[i:i + 1, :] for i in range(a))


# ----------------------------------------------------------------------------
# Deterministic parameter construction (synthetic kernel, no checkpoint load)
# ----------------------------------------------------------------------------
def _linear_init(key, fan_in, fan_out):
    kw, kb = jax.random.split(key)
    bound = 1.0 / float(np.sqrt(fan_in))
    w = jax.random.uniform(kw, (fan_in, fan_out), jnp.float32, -bound, bound)
    b = jax.random.uniform(kb, (1, fan_out), jnp.float32, -bound, bound)
    return w, b


def init_fcblock(key, in_dim, hidden, num_hidden, out_dim):
    # TODO(synk): num_hidden == 0 would hand Mosaic a zero-sized VMEM ref; guarded.
    assert num_hidden >= 1
    ks = jax.random.split(key, num_hidden + 2)
    w_in, b_in = _linear_init(ks[0], in_dim, hidden)
    w_hs, b_hs = zip(*[_linear_init(ks[1 + i], hidden, hidden)
                       for i in range(num_hidden)])
    w_hid = jnp.stack(w_hs)                    # [num_hidden, H, H]
    b_hid = jnp.stack(b_hs)                    # [num_hidden, 1, H]
    w_out, b_out = _linear_init(ks[-1], hidden, out_dim)
    return (w_in, b_in, w_hid, b_hid, w_out, b_out)


def init_repeater(key, s_dim, hidden, num_hidden, out_dim):
    assert num_hidden >= 1
    ks = jax.random.split(key, num_hidden + 2)
    # First layer drawn as the concat-form [2*s_dim, H] matrix, then pre-split.
    w_in, b_in = _linear_init(ks[0], 2 * s_dim, hidden)
    w_in_s, w_in_a = w_in[:s_dim], w_in[s_dim:]
    w_hs, b_hs = zip(*[_linear_init(ks[1 + i], hidden, hidden)
                       for i in range(num_hidden)])
    w_hid = jnp.stack(w_hs)
    b_hid = jnp.stack(b_hs)
    w_out, b_out = _linear_init(ks[-1], hidden, out_dim)
    return (w_in_s, w_in_a, b_in, w_hid, b_hid, w_out, b_out)


# ----------------------------------------------------------------------------
# Host-side grammar machinery (data-dependent recursion -> no Pallas equivalent)
# ----------------------------------------------------------------------------
class FuncNode:
    def __init__(self, token):
        self.token = token
        self.children = []
        self.function = None


class CFG:
    def __init__(self, cfg_diction, arg_diction):
        self.cfg_diction = cfg_diction
        self.arg_diction = arg_diction


class PallasDecoder:
    def __init__(self, s_dim, k_dim, latent_dim, cfg, key):
        self.k_dim = k_dim
        self.cfg = cfg
        self.cfg_enabled = True
        self.counter = 0
        self.monte_carlo_enabled = False
        k1, k2, k3 = jax.random.split(key, 3)
        self.key_proj = init_fcblock(k1, k_dim, _HIDDEN, 4, latent_dim)
        self.signal_proj = init_fcblock(k2, s_dim, _HIDDEN, 4, latent_dim)
        self.repeater = init_repeater(k3, s_dim, _HIDDEN, 3, s_dim)
        self.logprob = 0

    def forward(self, x, token_features, keys, dfs_seq=None):
        start_node = FuncNode('root')
        self.counter = 0
        logprob_acc = 0.0

        # Hoisted out of the recursion: key projection is loop-invariant.
        # Rows come back unit-normalized so cosine per node is one tiny matmul.
        k_unit = key_projection(token_features, self.key_proj)

        def parse_node(node, s):
            nonlocal logprob_acc
            # One fused pallas_call per node: signal_proj MLP + cosine(K,S) +
            # temperature-9 softmax and log-softmax (S never leaves VMEM).
            probs_d, neglog_d = signal_distribution(s, k_unit, self.signal_proj)
            probs = np.asarray(probs_d).reshape(-1)
            neglog = np.asarray(neglog_d).reshape(-1)

            if dfs_seq is not None:
                idx = keys.index(dfs_seq[self.counter])
                self.counter += 1
            elif self.monte_carlo_enabled:
                idx = int(np.argmax(probs))
            else:
                # TODO(synk): host-side categorical sampling (np.random.choice)
                # has no in-kernel equivalent; recursion is host-driven anyway.
                p = probs.astype(np.float64)
                p = p / p.sum()
                idx = int(np.random.choice(len(keys), p=p))
            token_chosen = keys[idx]
            logprob_acc += float(neglog[idx])   # == -log softmax(9*cos)[idx]

            inputs_status = self.cfg.cfg_diction[token_chosen]
            current_node = FuncNode(token_chosen)
            node.children.append(current_node)
            if inputs_status['input_types'] is not None:
                if len(inputs_status['input_types']) == 0:
                    current_node.function = True
                else:
                    arg_features = self.cfg.arg_diction[token_chosen]  # [A, s_dim]
                    # One batched repeater launch per node (not per child).
                    child_signals = repeater_signals(s, arg_features, self.repeater)
                    for cs in child_signals:
                        parse_node(current_node, cs)
            else:
                current_node.function = False

        parse_node(start_node, x)
        self.logprob = jnp.float32(logprob_acc)
        return start_node.children[0], self.logprob


# ----------------------------------------------------------------------------
# Pure-JAX reference (correctness check of the Pallas path)
# ----------------------------------------------------------------------------
def _ref_fcblock(x, params):
    w_in, b_in, w_hid, b_hid, w_out, b_out = params
    h = jnp.maximum(x @ w_in + b_in, 0.0)
    for i in range(w_hid.shape[0]):
        h = jnp.maximum(h @ w_hid[i] + b_hid[i], 0.0)
    return jnp.maximum(h @ w_out + b_out, 0.0)


def _ref_forward_logprob(x, token_features, keys, dfs_seq, decoder):
    K = _ref_fcblock(token_features, decoder.key_proj)
    Kn = K / jnp.maximum(jnp.linalg.norm(K, axis=-1, keepdims=True), 1e-8)
    state = {"counter": 0, "logprob": 0.0}

    def rec(s):
        S = _ref_fcblock(s, decoder.signal_proj)
        Sn = S / jnp.maximum(jnp.linalg.norm(S, axis=-1, keepdims=True), 1e-8)
        z = 9.0 * (Sn @ Kn.T).reshape(-1)
        logp = jax.nn.log_softmax(z)
        idx = keys.index(dfs_seq[state["counter"]])
        state["counter"] += 1
        state["logprob"] -= float(logp[idx])
        token = keys[idx]
        info = decoder.cfg.cfg_diction[token]
        if info['input_types'] is not None and len(info['input_types']) > 0:
            args = decoder.cfg.arg_diction[token]
            w_in_s, w_in_a, b_in, w_hid, b_hid, w_out, b_out = decoder.repeater
            h = jnp.maximum(s @ w_in_s + args @ w_in_a + b_in, 0.0)
            for i in range(w_hid.shape[0]):
                h = jnp.maximum(h @ w_hid[i] + b_hid[i], 0.0)
            cs = jnp.maximum(h @ w_out + b_out, 0.0)
            for i in range(args.shape[0]):
                rec(cs[i:i + 1, :])

    rec(x)
    return state["logprob"]


# ----------------------------------------------------------------------------
# Main
# ----------------------------------------------------------------------------
if __name__ == "__main__":
    s_dim, k_dim, latent_dim = 32, 32, 16
    keys_list = ['f_add', 'f_neg', 'zero', 'one', 'var_x', 'var_y', 'nil0', 'nil1']
    N = len(keys_list)

    root_key = jax.random.PRNGKey(0)
    k_feat, k_arg2, k_arg1, k_x, k_params = jax.random.split(root_key, 5)

    cfg_diction = {
        'f_add': {'input_types': ['any', 'any']},
        'f_neg': {'input_types': ['any']},
        'zero':  {'input_types': []},
        'one':   {'input_types': []},
        'var_x': {'input_types': None},
        'var_y': {'input_types': None},
        'nil0':  {'input_types': None},
        'nil1':  {'input_types': None},
    }
    arg_diction = {
        'f_add': jax.random.normal(k_arg2, (2, s_dim), jnp.float32),
        'f_neg': jax.random.normal(k_arg1, (1, s_dim), jnp.float32),
    }
    cfg = CFG(cfg_diction, arg_diction)

    decoder = PallasDecoder(s_dim, k_dim, latent_dim, cfg, k_params)

    token_features = jax.random.normal(k_feat, (N, k_dim), jnp.float32)
    x = jax.random.normal(k_x, (1, s_dim), jnp.float32)

    # Deterministic teacher-forced parse: f_add( f_neg( zero ), var_x )
    dfs_seq = ['f_add', 'f_neg', 'zero', 'var_x']
    tree, logprob = decoder.forward(x, token_features, keys_list, dfs_seq=dfs_seq)
    jax.block_until_ready(logprob)

    assert tree.token == 'f_add' and len(tree.children) == 2
    assert tree.children[0].token == 'f_neg'
    assert tree.children[1].token == 'var_x'
    assert bool(jnp.isfinite(logprob))

    with jax.default_matmul_precision("highest"):
        ref_lp = _ref_forward_logprob(x, token_features, keys_list, dfs_seq, decoder)
    assert abs(float(logprob) - ref_lp) <= 1e-2 + 1e-2 * abs(ref_lp), \
        (float(logprob), ref_lp)

    print("KERNEL_OK")
</pallas_src>

<mosaic_0001>
module attributes {stable_mosaic.version = 11 : i64} {
  func.func @_key_proj_kernel(%arg0: memref<8x32xf32, #tpu.memory_space<vmem>>, %arg1: memref<32x128xf32, #tpu.memory_space<vmem>>, %arg2: memref<1x128xf32, #tpu.memory_space<vmem>>, %arg3: memref<4x128x128xf32, #tpu.memory_space<vmem>>, %arg4: memref<4x1x128xf32, #tpu.memory_space<vmem>>, %arg5: memref<128x16xf32, #tpu.memory_space<vmem>>, %arg6: memref<1x16xf32, #tpu.memory_space<vmem>>, %arg7: memref<8x16xf32, #tpu.memory_space<vmem>>) attributes {dimension_semantics = [], scalar_prefetch = 0 : i64, scratch_operands = 0 : i64, tpu.core_type = #tpu.core_type<tc>} {
    %c0 = arith.constant 0 : index
    %c0_0 = arith.constant 0 : index
    %0 = vector.load %arg0[%c0, %c0_0] : memref<8x32xf32, #tpu.memory_space<vmem>>, vector<8x32xf32>
    %c0_1 = arith.constant 0 : index
    %c0_2 = arith.constant 0 : index
    %1 = vector.load %arg1[%c0_1, %c0_2] : memref<32x128xf32, #tpu.memory_space<vmem>>, vector<32x128xf32>
    %cst = arith.constant dense<0.000000e+00> : vector<8x128xf32>
    %2 = tpu.matmul %0, %1, %cst {dimension_numbers = #tpu.dot_dimension_numbers<[1], [0], [0], [1], [0, 0, 1, 1], [], []>} : vector<8x32xf32>, vector<32x128xf32>, vector<8x128xf32> -> vector<8x128xf32>
    %c0_3 = arith.constant 0 : index
    %c0_4 = arith.constant 0 : index
    %3 = vector.load %arg2[%c0_3, %c0_4] : memref<1x128xf32, #tpu.memory_space<vmem>>, vector<1x128xf32>
    %4 = vector.broadcast %3 : vector<1x128xf32> to vector<8x128xf32>
    %5 = arith.addf %2, %4 : vector<8x128xf32>
    %cst_5 = arith.constant 0.000000e+00 : f32
    %6 = vector.broadcast %cst_5 : f32 to vector<8x128xf32>
    %7 = arith.maximumf %5, %6 : vector<8x128xf32>
    %c0_6 = arith.constant 0 : index
    %c0_7 = arith.constant 0 : index
    %c0_8 = arith.constant 0 : index
    %8 = vector.load %arg3[%c0_6, %c0_7, %c0_8] : memref<4x128x128xf32, #tpu.memory_space<vmem>>, vector<1x128x128xf32>
    %9 = vector.shape_cast %8 : vector<1x128x128xf32> to vector<128x128xf32>
    %cst_9 = arith.constant dense<0.000000e+00> : vector<8x128xf32>
    %10 = tpu.matmul %7, %9, %cst_9 {dimension_numbers = #tpu.dot_dimension_numbers<[1], [0], [0], [1], [0, 0, 1, 1], [], []>} : vector<8x128xf32>, vector<128x128xf32>, vector<8x128xf32> -> vector<8x128xf32>
    %c0_10 = arith.constant 0 : index
    %c0_11 = arith.constant 0 : index
    %c0_12 = arith.constant 0 : index
    %11 = vector.load %arg4[%c0_10, %c0_11, %c0_12] : memref<4x1x128xf32, #tpu.memory_space<vmem>>, vector<1x1x128xf32>
    %12 = vector.shape_cast %11 : vector<1x1x128xf32> to vector<1x128xf32>
    %13 = vector.broadcast %12 : vector<1x128xf32> to vector<8x128xf32>
    %14 = arith.addf %10, %13 : vector<8x128xf32>
    %cst_13 = arith.constant 0.000000e+00 : f32
    %15 = vector.broadcast %cst_13 : f32 to vector<8x128xf32>
    %16 = arith.maximumf %14, %15 : vector<8x128xf32>
    %c1 = arith.constant 1 : index
    %c0_14 = arith.constant 0 : index
    %c0_15 = arith.constant 0 : index
    %17 = vector.load %arg3[%c1, %c0_14, %c0_15] : memref<4x128x128xf32, #tpu.memory_space<vmem>>, vector<1x128x128xf32>
    %18 = vector.shape_cast %17 : vector<1x128x128xf32> to vector<128x128xf32>
    %cst_16 = arith.constant dense<0.000000e+00> : vector<8x128xf32>
    %19 = tpu.matmul %16, %18, %cst_16 {dimension_numbers = #tpu.dot_dimension_numbers<[1], [0], [0], [1], [0, 0, 1, 1], [], []>} : vector<8x128xf32>, vector<128x128xf32>, vector<8x128xf32> -> vector<8x128xf32>
    %c1_17 = arith.constant 1 : index
    %c0_18 = arith.constant 0 : index
    %c0_19 = arith.constant 0 : index
    %20 = vector.load %arg4[%c1_17, %c0_18, %c0_19] : memref<4x1x128xf32, #tpu.memory_space<vmem>>, vector<1x1x128xf32>
    %21 = vector.shape_cast %20 : vector<1x1x128xf32> to vector<1x128xf32>
    %22 = vector.broadcast %21 : vector<1x128xf32> to vector<8x128xf32>
    %23 = arith.addf %19, %22 : vector<8x128xf32>
    %cst_20 = arith.constant 0.000000e+00 : f32
    %24 = vector.broadcast %cst_20 : f32 to vector<8x128xf32>
    %25 = arith.maximumf %23, %24 : vector<8x128xf32>
    %c2 = arith.constant 2 : index
    %c0_21 = arith.constant 0 : index
    %c0_22 = arith.constant 0 : index
    %26 = vector.load %arg3[%c2, %c0_21, %c0_22] : memref<4x128x128xf32, #tpu.memory_space<vmem>>, vector<1x128x128xf32>
    %27 = vector.shape_cast %26 : vector<1x128x128xf32> to vector<128x128xf32>
    %cst_23 = arith.constant dense<0.000000e+00> : vector<8x128xf32>
    %28 = tpu.matmul %25, %27, %cst_23 {dimension_numbers = #tpu.dot_dimension_numbers<[1], [0], [0], [1], [0, 0, 1, 1], [], []>} : vector<8x128xf32>, vector<128x128xf32>, vector<8x128xf32> -> vector<8x128xf32>
    %c2_24 = arith.constant 2 : index
    %c0_25 = arith.constant 0 : index
    %c0_26 = arith.constant 0 : index
    %29 = vector.load %arg4[%c2_24, %c0_25, %c0_26] : memref<4x1x128xf32, #tpu.memory_space<vmem>>, vector<1x1x128xf32>
    %30 = vector.shape_cast %29 : vector<1x1x128xf32> to vector<1x128xf32>
    %31 = vector.broadcast %30 : vector<1x128xf32> to vector<8x128xf32>
    %32 = arith.addf %28, %31 : vector<8x128xf32>
    %cst_27 = arith.constant 0.000000e+00 : f32
    %33 = vector.broadcast %cst_27 : f32 to vector<8x128xf32>
    %34 = arith.maximumf %32, %33 : vector<8x128xf32>
    %c3 = arith.constant 3 : index
    %c0_28 = arith.constant 0 : index
    %c0_29 = arith.constant 0 : index
    %35 = vector.load %arg3[%c3, %c0_28, %c0_29] : memref<4x128x128xf32, #tpu.memory_space<vmem>>, vector<1x128x128xf32>
    %36 = vector.shape_cast %35 : vector<1x128x128xf32> to vector<128x128xf32>
    %cst_30 = arith.constant dense<0.000000e+00> : vector<8x128xf32>
    %37 = tpu.matmul %34, %36, %cst_30 {dimension_numbers = #tpu.dot_dimension_numbers<[1], [0], [0], [1], [0, 0, 1, 1], [], []>} : vector<8x128xf32>, vector<128x128xf32>, vector<8x128xf32> -> vector<8x128xf32>
    %c3_31 = arith.constant 3 : index
    %c0_32 = arith.constant 0 : index
    %c0_33 = arith.constant 0 : index
    %38 = vector.load %arg4[%c3_31, %c0_32, %c0_33] : memref<4x1x128xf32, #tpu.memory_space<vmem>>, vector<1x1x128xf32>
    %39 = vector.shape_cast %38 : vector<1x1x128xf32> to vector<1x128xf32>
    %40 = vector.broadcast %39 : vector<1x128xf32> to vector<8x128xf32>
    %41 = arith.addf %37, %40 : vector<8x128xf32>
    %cst_34 = arith.constant 0.000000e+00 : f32
    %42 = vector.broadcast %cst_34 : f32 to vector<8x128xf32>
    %43 = arith.maximumf %41, %42 : vector<8x128xf32>
    %c0_35 = arith.constant 0 : index
    %c0_36 = arith.constant 0 : index
    %44 = vector.load %arg5[%c0_35, %c0_36] : memref<128x16xf32, #tpu.memory_space<vmem>>, vector<128x16xf32>
    %cst_37 = arith.constant dense<0.000000e+00> : vector<8x16xf32>
    %45 = tpu.matmul %43, %44, %cst_37 {dimension_numbers = #tpu.dot_dimension_numbers<[1], [0], [0], [1], [0, 0, 1, 1], [], []>} : vector<8x128xf32>, vector<128x16xf32>, vector<8x16xf32> -> vector<8x16xf32>
    %c0_38 = arith.constant 0 : index
    %c0_39 = arith.constant 0 : index
    %46 = vector.load %arg6[%c0_38, %c0_39] : memref<1x16xf32, #tpu.memory_space<vmem>>, vector<1x16xf32>
    %47 = vector.broadcast %46 : vector<1x16xf32> to vector<8x16xf32>
    %48 = arith.addf %45, %47 : vector<8x16xf32>
    %cst_40 = arith.constant 0.000000e+00 : f32
    %49 = vector.broadcast %cst_40 : f32 to vector<8x16xf32>
    %50 = arith.maximumf %48, %49 : vector<8x16xf32>
    %51 = arith.mulf %50, %50 : vector<8x16xf32>
    %cst_41 = arith.constant dense<0.000000e+00> : vector<8xf32>
    %52 = vector.multi_reduction <add>, %51, %cst_41 [1] : vector<8x16xf32> to vector<8xf32>
    %53 = vector.shape_cast %52 : vector<8xf32> to vector<8x1xf32>
    %cst_42 = arith.constant 1.000000e-16 : f32
    %54 = vector.broadcast %cst_42 : f32 to vector<8x1xf32>
    %55 = arith.maximumf %53, %54 : vector<8x1xf32>
    %56 = math.rsqrt %55 : vector<8x1xf32>
    %57 = vector.broadcast %56 : vector<8x1xf32> to vector<8x16xf32>
    %58 = arith.mulf %50, %57 : vector<8x16xf32>
    %c0_43 = arith.constant 0 : index
    %c0_44 = arith.constant 0 : index
    %59 = vector.load %arg7[%c0_43, %c0_44] : memref<8x16xf32, #tpu.memory_space<vmem>>, vector<8x16xf32>
    tpu.vector_store %arg7[%c0_43, %c0_44], %58 {strides = array<i32>} : memref<8x16xf32, #tpu.memory_space<vmem>>, vector<8x16xf32>,
    return
  }
}

</mosaic_0001>

<bundles_post_ra>
// kernel: key_projection.1
= control target key start
LH: loop header
LB: loop body
LE: loop exit
PB: predicated region body
PF: predicated region fallthrough
CT: control target
= control target key end

     0   :  { %12 = vsyncpa [#allocation3], 0  ;;  %s1195_s0 = inlined_call_operand.vmem [shape: f32[8,32], index: 0, kind: input, shape index: {}]   ;;  %s1196_s1 = inlined_call_operand.vmem [shape: f32[32,128], index: 1, kind: input, shape index: {}]   ;;  %s1197_s2 = inlined_call_operand.vmem [shape: f32[1,128], index: 2, kind: input, shape index: {}]   ;;  %s1198_s3 = inlined_call_operand.hbm [shape: f32[4,128,128], index: 3, kind: input, shape index: {}]   ;;  %s1199_s4 = inlined_call_operand.vmem [shape: f32[4,1,128], index: 4, kind: input, shape index: {}]   ;;  %s1200_s5 = inlined_call_operand.vmem [shape: f32[128,16], index: 5, kind: input, shape index: {}]   ;;  %s1201_s6 = inlined_call_operand.vmem [shape: f32[1,16], index: 6, kind: input, shape index: {}]   ;;  %s1202_s7 = inlined_call_operand.hbm [shape: f32[8,16], index: 7, kind: output, shape index: {}]  }
   0x1   :  { %13 = vsyncpa [#allocation4], 0  ;;  %s966_s24 = smov [#allocation2]  }
   0x2   :  { %s25_s25 = sshll.u32 %s966_s24, 4  ;;  %s26_s25 = int_to_ptr.vmem [resolvable:$true] %s25_s25 }
   0x3   :  { %s930_s26 = scalar_lea.vmem %s26_s25, 8192  ;;  %p935_p1 = scmp.lt.s32.totalorder %s26_s25, %s26_s25 }
   0x4   :  { %p931_p0 = scmp.ne.s32.totalorder %s26_s25, %s930_s26  ;;  %p936_p2 = scmp.lt.s32.totalorder %s930_s26, %s930_s26 }
   0x6   :  { %p937_p3 = por %p936_p2, %p935_p1 }
   0x8   :  { %p938_p4 = pnand %p937_p3, %p931_p0 }
   0xa   :  { %941 = shalt.err (!%p938_p4)
}
   0xb   :  { %s967_s27 = smov 128   ;;  %s968_s28 = smov 8  }
   0xc   :  { %31 = dma.hbm_to_vmem [thread:$0]  %s1198_s3, 8192, %s26_s25, [#allocation3], %s967_s27, %s967_s27, %s968_s28  }
   0xd   :  { %962 = dma.done.wait [#allocation3], 8192  }
   0xe   :  { %963 = vsyncadd [#allocation3], 4294959104  ;;  %v969_v0 = vmov 0.0   ;;  %vm970_vm0 = vmmov 0   ;;  %v45_v1 = vld [vmem:[%s1196_s1 + $0x18] sm:$0xff]  ;;  %v44_v2 = vld [vmem:[%s1196_s1 + $0x10] sm:$0xff] }
   0xf   :  { %728 = vmatprep.subr.mxu0 %v969_v0  ;;  %736 = vmatprep.mubr.msk.f32.mxu0 %vm970_vm0, %v969_v0  ;;  %v143_v3 = vld [vmem:[#allocation2 + $0x78] sm:$0xff]  ;;  %v43_v4 = vld [vmem:[%s1196_s1 + $0x8] sm:$0xff]  ;;  %v142_v5 = vld [vmem:[#allocation2 + $0x70] sm:$0xff]  ;;  %vm53_vm1 = vcmask 261120   ;;  %vm605_vm2 = vcmask 130048  }
  0x10   :  { %739 = vmatprep.subr.mxu1 %v969_v0  ;;  %771 = vmatprep.mubr.msk.f32.mxu1 %vm970_vm0, %v969_v0  ;;  %v141_v6 = vld [vmem:[#allocation2 + $0x68] sm:$0xff]  ;;  %v42_v7 = vld [vmem:[%s1196_s1] sm:$0xff]  ;;  %v139_v10 = vld [vmem:[#allocation2 + $0x58] sm:$0xff] }
  0x11   :  { %729 = vmatpush3.msra.mxu0 %v45_v1  ;;  %740 = vmatpush3.msra.mxu1 %v143_v3  ;;  %v41_v8 = vld [vmem:[%s1195_s0] sm:$0xff]  ;;  %v138_v11 = vld [vmem:[#allocation2 + $0x50] sm:$0xff]  ;;  %v137_v12 = vld [vmem:[#allocation2 + $0x48] sm:$0xff] }
  0x12   :  { %730 = vmatprep.subr.mxu0 %v969_v0  ;;  %741 = vmatprep.subr.mxu1 %v969_v0  ;;  %v140_v9 = vld [vmem:[#allocation2 + $0x60] sm:$0xff]  ;;  %v135_v14 = vld [vmem:[#allocation2 + $0x38] sm:$0xff]  ;;  %v134_v15 = vld [vmem:[#allocation2 + $0x30] sm:$0xff] }
  0x13   :  { %731 = vmatpush3.msra.mxu0 %v44_v2  ;;  %742 = vmatpush3.msra.mxu1 %v142_v5  ;;  %v136_v13 = vld [vmem:[#allocation2 + $0x40] sm:$0xff]  ;;  %v133_v16 = vld [vmem:[#allocation2 + $0x28] sm:$0xff]  ;;  %v131_v18 = vld [vmem:[#allocation2 + $0x18] sm:$0xff] }
  0x14   :  { %732 = vmatprep.subr.mxu0 %v969_v0  ;;  %743 = vmatprep.subr.mxu1 %v969_v0  ;;  %v132_v17 = vld [vmem:[#allocation2 + $0x20] sm:$0xff]  ;;  %v130_v19 = vld [vmem:[#allocation2 + $0x10] sm:$0xff]  ;;  %v129_v20 = vld [vmem:[#allocation2 + $0x8] sm:$0xff] }
  0x15   :  { %733 = vmatpush3.msra.mxu0 %v43_v4  ;;  %744 = vmatpush3.msra.mxu1 %v141_v6  ;;  %v128_v21 = vld [vmem:[#allocation2] sm:$0xff]  ;;  %v238_v22 = vld [vmem:[#allocation2 + $0xf8] sm:$0xff]  ;;  %v237_v23 = vld [vmem:[#allocation2 + $0xf0] sm:$0xff] }
  0x16   :  { %734 = vmatprep.subr.mxu0 %v969_v0  ;;  %745 = vmatprep.subr.mxu1 %v969_v0  ;;  %v236_v24 = vld [vmem:[#allocation2 + $0xe8] sm:$0xff]  ;;  %v235_v25 = vld [vmem:[#allocation2 + $0xe0] sm:$0xff]  ;;  %v234_v26 = vld [vmem:[#allocation2 + $0xd8] sm:$0xff] }
  0x17   :  { %735 = vmatpush3.msra.mxu0 %v42_v7  ;;  %746 = vmatpush3.msra.mxu1 %v140_v9  ;;  %v233_v27 = vld [vmem:[#allocation2 + $0xd0] sm:$0xff]  ;;  %v232_v28 = vld [vmem:[#allocation2 + $0xc8] sm:$0xff]  ;;  %v231_v29 = vld [vmem:[#allocation2 + $0xc0] sm:$0xff] }
  0x18   :  { %737 = vmatmul.mubr.msk.f32.vlgmr.msra.gmra.mxu0 %vm53_vm1, %v41_v8  ;;  %747 = vmatprep.subr.mxu1 %v969_v0  ;;  %v230_v30 = vld [vmem:[#allocation2 + $0xb8] sm:$0xff]  ;;  %v229_v31 = vld [vmem:[#allocation2 + $0xb0] sm:$0xff]  ;;  %v228_v32 = vld [vmem:[#allocation2 + $0xa8] sm:$0xff] }
  0x19   :  { %774 = vmatprep.subr.mxu0 %v969_v0  ;;  %748 = vmatpush3.msra.mxu1 %v139_v10  ;;  %v227_v33 = vld [vmem:[#allocation2 + $0xa0] sm:$0xff]  ;;  %v226_v34 = vld [vmem:[#allocation2 + $0x98] sm:$0xff]  ;;  %v225_v40 = vld [vmem:[#allocation2 + $0x90] sm:$0xff] }
  0x1a   :  { %806 = vmatprep.mubr.msk.f32.mxu0 %vm970_vm0, %v969_v0  ;;  %749 = vmatprep.subr.mxu1 %v969_v0  ;;  %v628_v35 = vld [vmem:[%s1197_s2] ss:$0 sm:$0xff]  ;;  %v224_v41 = vld [vmem:[#allocation2 + $0x88] sm:$0xff]  ;;  %v334_v43 = vld [vmem:[#allocation2 + $0x178] sm:$0xff] }
  0x1b   :  { %750 = vmatpush3.msra.mxu1 %v138_v11  ;;  %775 = vmatpush3.msra.mxu0 %v238_v22  ;;  %v223_v42 = vld [vmem:[#allocation2 + $0x80] sm:$0xff]  ;;  %v333_v44 = vld [vmem:[#allocation2 + $0x170] sm:$0xff]  ;;  %v332_v45 = vld [vmem:[#allocation2 + $0x168] sm:$0xff] }
  0x1c   :  { %751 = vmatprep.subr.mxu1 %v969_v0  ;;  %776 = vmatprep.subr.mxu0 %v969_v0  ;;  %v331_v46 = vld [vmem:[#allocation2 + $0x160] sm:$0xff]  ;;  %v330_v47 = vld [vmem:[#allocation2 + $0x158] sm:$0xff]  ;;  %v329_v48 = vld [vmem:[#allocation2 + $0x150] sm:$0xff] }
  0x1d   :  { %752 = vmatpush3.msra.mxu1 %v137_v12  ;;  %777 = vmatpush3.msra.mxu0 %v237_v23  ;;  %v328_v49 = vld [vmem:[#allocation2 + $0x148] sm:$0xff]  ;;  %v327_v50 = vld [vmem:[#allocation2 + $0x140] sm:$0xff]  ;;  %v326_v51 = vld [vmem:[#allocation2 + $0x138] sm:$0xff] }
  0x1e   :  { %753 = vmatprep.subr.mxu1 %v969_v0  ;;  %778 = vmatprep.subr.mxu0 %v969_v0  ;;  %v325_v52 = vld [vmem:[#allocation2 + $0x130] sm:$0xff]  ;;  %v324_v53 = vld [vmem:[#allocation2 + $0x128] sm:$0xff]  ;;  %v323_v54 = vld [vmem:[#allocation2 + $0x120] sm:$0xff] }
  0x1f   :  { %754 = vmatpush3.msra.mxu1 %v136_v13  ;;  %779 = vmatpush3.msra.mxu0 %v236_v24  ;;  %v322_v55 = vld [vmem:[#allocation2 + $0x118] sm:$0xff]  ;;  %v630_v56 = vld [vmem:[%s1199_s4] ss:$0 sm:$0xff]  ;;  %v321_v61 = vld [vmem:[#allocation2 + $0x110] sm:$0xff] }
  0x20   :  { %755 = vmatprep.subr.mxu1 %v969_v0  ;;  %780 = vmatprep.subr.mxu0 %v969_v0  ;;  %v320_v62 = vld [vmem:[#allocation2 + $0x108] sm:$0xff]  ;;  %v319_v63 = vld [vmem:[#allocation2 + $0x100] sm:$0xff]  ;;  %v430_v1 = vld [vmem:[#allocation2 + $0x1f8] sm:$0xff] }
  0x21   :  { %756 = vmatpush3.msra.mxu1 %v135_v14  ;;  %781 = vmatpush3.msra.mxu0 %v235_v25  ;;  %v429_v2 = vld [vmem:[#allocation2 + $0x1f0] sm:$0xff]  ;;  %v428_v3 = vld [vmem:[#allocation2 + $0x1e8] sm:$0xff]  ;;  %v427_v4 = vld [vmem:[#allocation2 + $0x1e0] sm:$0xff] }
  0x22   :  { %757 = vmatprep.subr.mxu1 %v969_v0  ;;  %782 = vmatprep.subr.mxu0 %v969_v0  ;;  %v426_v5 = vld [vmem:[#allocation2 + $0x1d8] sm:$0xff]  ;;  %v425_v6 = vld [vmem:[#allocation2 + $0x1d0] sm:$0xff]  ;;  %v424_v7 = vld [vmem:[#allocation2 + $0x1c8] sm:$0xff] }
  0x23   :  { %758 = vmatpush3.msra.mxu1 %v134_v15  ;;  %783 = vmatpush3.msra.mxu0 %v234_v26  ;;  %v423_v8 = vld [vmem:[#allocation2 + $0x1c0] sm:$0xff]  ;;  %v422_v9 = vld [vmem:[#allocation2 + $0x1b8] sm:$0xff]  ;;  %v421_v10 = vld [vmem:[#allocation2 + $0x1b0] sm:$0xff] }
  0x24   :  { %759 = vmatprep.subr.mxu1 %v969_v0  ;;  %784 = vmatprep.subr.mxu0 %v969_v0  ;;  %v420_v11 = vld [vmem:[#allocation2 + $0x1a8] sm:$0xff]  ;;  %v419_v12 = vld [vmem:[#allocation2 + $0x1a0] sm:$0xff]  ;;  %v418_v13 = vld [vmem:[#allocation2 + $0x198] sm:$0xff] }
  0x25   :  { %760 = vmatpush3.msra.mxu1 %v133_v16  ;;  %785 = vmatpush3.msra.mxu0 %v233_v27  ;;  %v632_v14 = vld [vmem:[%s1199_s4 + $0x1] ss:$0 sm:$0xff]  ;;  %v525_v22 = vld [vmem:[%s1200_s5 + $0x78] sm:$0xff]  ;;  %v524_v23 = vld [vmem:[%s1200_s5 + $0x70] sm:$0xff] }
  0x26   :  { %761 = vmatprep.subr.mxu1 %v969_v0  ;;  %786 = vmatprep.subr.mxu0 %v969_v0  ;;  %v523_v24 = vld [vmem:[%s1200_s5 + $0x68] sm:$0xff]  ;;  %v522_v25 = vld [vmem:[%s1200_s5 + $0x60] sm:$0xff]  ;;  %v521_v26 = vld [vmem:[%s1200_s5 + $0x58] sm:$0xff] }
  0x27   :  { %762 = vmatpush3.msra.mxu1 %v132_v17  ;;  %787 = vmatpush3.msra.mxu0 %v232_v28  ;;  %v520_v27 = vld [vmem:[%s1200_s5 + $0x50] sm:$0xff]  ;;  %v519_v28 = vld [vmem:[%s1200_s5 + $0x48] sm:$0xff] }
  0x28   :  { %763 = vmatprep.subr.mxu1 %v969_v0  ;;  %788 = vmatprep.subr.mxu0 %v969_v0 }
  0x29   :  { %764 = vmatpush3.msra.mxu1 %v131_v18  ;;  %789 = vmatpush3.msra.mxu0 %v231_v29  ;;  %v518_v29 = vld [vmem:[%s1200_s5 + $0x40] sm:$0xff] }
  0x2a   :  { %765 = vmatprep.subr.mxu1 %v969_v0  ;;  %790 = vmatprep.subr.mxu0 %v969_v0 }
  0x2b   :  { %766 = vmatpush3.msra.mxu1 %v130_v19  ;;  %791 = vmatpush3.msra.mxu0 %v230_v30  ;;  %v417_v19 = vld [vmem:[#allocation2 + $0x190] sm:$0xff]  ;;  %v517_v30 = vld [vmem:[%s1200_s5 + $0x38] sm:$0xff] }
  0x2c   :  { %767 = vmatprep.subr.mxu1 %v969_v0  ;;  %792 = vmatprep.subr.mxu0 %v969_v0 }
  0x2d   :  { %768 = vmatpush3.msra.mxu1 %v129_v20  ;;  %793 = vmatpush3.msra.mxu0 %v229_v31  ;;  %v416_v20 = vld [vmem:[#allocation2 + $0x188] sm:$0xff]  ;;  %v516_v31 = vld [vmem:[%s1200_s5 + $0x30] sm:$0xff] }
  0x2e   :  { %769 = vmatprep.subr.mxu1 %v969_v0  ;;  %794 = vmatprep.subr.mxu0 %v969_v0 }
  0x2f   :  { %770 = vmatpush3.msra.mxu1 %v128_v21  ;;  %795 = vmatpush3.msra.mxu0 %v228_v32  ;;  %v415_v21 = vld [vmem:[#allocation2 + $0x180] sm:$0xff]  ;;  %v515_v32 = vld [vmem:[%s1200_s5 + $0x28] sm:$0xff] }
  0x30   :  { %809 = vmatprep.subr.mxu1 %v969_v0  ;;  %796 = vmatprep.subr.mxu0 %v969_v0 }
  0x31   :  { %797 = vmatpush3.msra.mxu0 %v227_v33  ;;  %v514_v33 = vld [vmem:[%s1200_s5 + $0x20] sm:$0xff] }
  0x32   :  { %798 = vmatprep.subr.mxu0 %v969_v0 }
  0x33   :  { %799 = vmatpush3.msra.mxu0 %v226_v34  ;;  %v513_v34 = vld [vmem:[%s1200_s5 + $0x18] sm:$0xff] }
  0x34   :  { %800 = vmatprep.subr.mxu0 %v969_v0 }
  0x35   :  { %801 = vmatpush3.msra.mxu0 %v225_v40  ;;  %v512_v40 = vld [vmem:[%s1200_s5 + $0x10] sm:$0xff] }
  0x36   :  { %802 = vmatprep.subr.mxu0 %v969_v0 }
  0x37   :  { %803 = vmatpush3.msra.mxu0 %v224_v41  ;;  %v511_v41 = vld [vmem:[%s1200_s5 + $0x8] sm:$0xff] }
  0x38   :  { %804 = vmatprep.subr.mxu0 %v969_v0 }
  0x39   :  { %805 = vmatpush3.msra.mxu0 %v223_v42  ;;  %v510_v42 = vld [vmem:[%s1200_s5] sm:$0xff] }
  0x3a   :  { %844 = vmatprep.subr.mxu0 %v969_v0 }
  0xd8   :  { %v123_v36 = vpop.f32.mrf.mxu0 }
  0xd9   :  { %v124_v37 = vadd.f32 %v628_v35, %v123_v36  ;;  %v634_v35 = vld [vmem:[%s1199_s4 + $0x2] ss:$0 sm:$0xff] }
  0xda   :  { %v738_v38 = vpop.f32.mrf.mxu0 }
  0xdb   :  { %v127_v39 = vmax.f32 %v124_v37, 0.0 }
  0xdd   :  { %772 = vmatmul.mubr.f32.vlgmr.msra.gmra.mxu1 %v127_v39 }
  0xde   :  { %841 = vmatprep.mubr.msk.f32.mxu1 %vm970_vm0, %v969_v0  ;;  %810 = vmatpush3.msra.mxu1 %v334_v43  ;;  %v636_v43 = vld [vmem:[%s1199_s4 + $0x3] ss:$0 sm:$0xff]  ;;  %s971_s4 = smov [#allocation5]  }
  0xdf   :  { %811 = vmatprep.subr.mxu1 %v969_v0  ;;  %s619_s5 = sshll.u32 %s971_s4, 4  ;;  %s620_s5 = int_to_ptr.vmem [resolvable:$true] %s619_s5 }
  0xe0   :  { %812 = vmatpush3.msra.mxu1 %v333_v44  ;;  %s942_s8 = scalar_lea.vmem %s620_s5, 128  ;;  %p947_p6 = scmp.lt.s32.totalorder %s620_s5, %s620_s5 }
  0xe1   :  { %813 = vmatprep.subr.mxu1 %v969_v0  ;;  %p943_p5 = scmp.ne.s32.totalorder %s620_s5, %s942_s8  ;;  %p948_p7 = scmp.lt.s32.totalorder %s942_s8, %s942_s8 }
  0xe2   :  { %814 = vmatpush3.msra.mxu1 %v332_v45 }
  0xe3   :  { %815 = vmatprep.subr.mxu1 %v969_v0  ;;  %p949_p8 = por %p948_p7, %p947_p6 }
  0xe4   :  { %816 = vmatpush3.msra.mxu1 %v331_v46 }
  0xe5   :  { %817 = vmatprep.subr.mxu1 %v969_v0  ;;  %p950_p9 = pnand %p949_p8, %p943_p5 }
  0xe6   :  { %818 = vmatpush3.msra.mxu1 %v330_v47 }
  0xe7   :  { %819 = vmatprep.subr.mxu1 %v969_v0 }
  0xe8   :  { %820 = vmatpush3.msra.mxu1 %v329_v48  ;;  %v637_v48 = vld [vmem:[%s1201_s6] ss:$0 sm:$0xff] }
  0xe9   :  { %821 = vmatprep.subr.mxu1 %v969_v0 }
  0xea   :  { %822 = vmatpush3.msra.mxu1 %v328_v49 }
  0xeb   :  { %823 = vmatprep.subr.mxu1 %v969_v0 }
  0xec   :  { %824 = vmatpush3.msra.mxu1 %v327_v50 }
  0xed   :  { %825 = vmatprep.subr.mxu1 %v969_v0 }
  0xee   :  { %826 = vmatpush3.msra.mxu1 %v326_v51 }
  0xef   :  { %827 = vmatprep.subr.mxu1 %v969_v0 }
  0xf0   :  { %828 = vmatpush3.msra.mxu1 %v325_v52 }
  0xf1   :  { %829 = vmatprep.subr.mxu1 %v969_v0 }
  0xf2   :  { %830 = vmatpush3.msra.mxu1 %v324_v53 }
  0xf3   :  { %831 = vmatprep.subr.mxu1 %v969_v0 }
  0xf4   :  { %832 = vmatpush3.msra.mxu1 %v323_v54 }
  0xf5   :  { %833 = vmatprep.subr.mxu1 %v969_v0 }
  0xf6   :  { %834 = vmatpush3.msra.mxu1 %v322_v55 }
  0xf7   :  { %835 = vmatprep.subr.mxu1 %v969_v0 }
  0xf8   :  { %836 = vmatpush3.msra.mxu1 %v321_v61 }
  0xf9   :  { %837 = vmatprep.subr.mxu1 %v969_v0 }
  0xfa   :  { %838 = vmatpush3.msra.mxu1 %v320_v62 }
  0xfb   :  { %839 = vmatprep.subr.mxu1 %v969_v0 }
  0xfc   :  { %840 = vmatpush3.msra.mxu1 %v319_v63 }
  0xfd   :  { %879 = vmatprep.subr.mxu1 %v969_v0 }
 0x19d   :  { %v217_v57 = vpop.f32.mrf.mxu1 }
 0x19e   :  { %v218_v58 = vadd.f32 %v630_v56, %v217_v57 }
 0x19f   :  { %v773_v59 = vpop.f32.mrf.mxu1 }
 0x1a0   :  { %v221_v60 = vmax.f32 %v218_v58, 0.0 }
 0x1a2   :  { %807 = vmatmul.mubr.f32.vlgmr.msra.gmra.mxu0 %v221_v60 }
 0x1a3   :  { %876 = vmatprep.mubr.msk.f32.mxu0 %vm970_vm0, %v969_v0  ;;  %845 = vmatpush3.msra.mxu0 %v430_v1 }
 0x1a4   :  { %846 = vmatprep.subr.mxu0 %v969_v0 }
 0x1a5   :  { %847 = vmatpush3.msra.mxu0 %v429_v2 }
 0x1a6   :  { %848 = vmatprep.subr.mxu0 %v969_v0 }
 0x1a7   :  { %849 = vmatpush3.msra.mxu0 %v428_v3 }
 0x1a8   :  { %850 = vmatprep.subr.mxu0 %v969_v0 }
 0x1a9   :  { %851 = vmatpush3.msra.mxu0 %v427_v4 }
 0x1aa   :  { %852 = vmatprep.subr.mxu0 %v969_v0 }
 0x1ab   :  { %853 = vmatpush3.msra.mxu0 %v426_v5 }
 0x1ac   :  { %854 = vmatprep.subr.mxu0 %v969_v0 }
 0x1ad   :  { %855 = vmatpush3.msra.mxu0 %v425_v6 }
 0x1ae   :  { %856 = vmatprep.subr.mxu0 %v969_v0 }
 0x1af   :  { %857 = vmatpush3.msra.mxu0 %v424_v7 }
 0x1b0   :  { %858 = vmatprep.subr.mxu0 %v969_v0 }
 0x1b1   :  { %859 = vmatpush3.msra.mxu0 %v423_v8 }
 0x1b2   :  { %860 = vmatprep.subr.mxu0 %v969_v0 }
 0x1b3   :  { %861 = vmatpush3.msra.mxu0 %v422_v9 }
 0x1b4   :  { %862 = vmatprep.subr.mxu0 %v969_v0 }
 0x1b5   :  { %863 = vmatpush3.msra.mxu0 %v421_v10 }
 0x1b6   :  { %864 = vmatprep.subr.mxu0 %v969_v0 }
 0x1b7   :  { %865 = vmatpush3.msra.mxu0 %v420_v11 }
 0x1b8   :  { %866 = vmatprep.subr.mxu0 %v969_v0 }
 0x1b9   :  { %867 = vmatpush3.msra.mxu0 %v419_v12 }
 0x1ba   :  { %868 = vmatprep.subr.mxu0 %v969_v0 }
 0x1bb   :  { %869 = vmatpush3.msra.mxu0 %v418_v13 }
 0x1bc   :  { %870 = vmatprep.subr.mxu0 %v969_v0 }
 0x1bd   :  { %871 = vmatpush3.msra.mxu0 %v417_v19 }
 0x1be   :  { %872 = vmatprep.subr.mxu0 %v969_v0 }
 0x1bf   :  { %873 = vmatpush3.msra.mxu0 %v416_v20 }
 0x1c0   :  { %874 = vmatprep.subr.mxu0 %v969_v0 }
 0x1c1   :  { %875 = vmatpush3.msra.mxu0 %v415_v21 }
 0x262   :  { %v313_v15 = vpop.f32.mrf.mxu0 }
 0x263   :  { %v314_v16 = vadd.f32 %v632_v14, %v313_v15 }
 0x264   :  { %v808_v17 = vpop.f32.mrf.mxu0 }
 0x265   :  { %v317_v18 = vmax.f32 %v314_v16, 0.0 }
 0x267   :  { %842 = vmatmul.mubr.f32.vlgmr.msra.gmra.mxu1 %v317_v18 }
 0x268   :  { %911 = vmatprep.mubr.msk.f32.mxu1 %vm970_vm0, %v969_v0  ;;  %880 = vmatpush3.msra.mxu1 %v525_v22 }
 0x269   :  { %881 = vmatprep.subr.mxu1 %v969_v0 }
 0x26a   :  { %882 = vmatpush3.msra.mxu1 %v524_v23 }
 0x26b   :  { %883 = vmatprep.subr.mxu1 %v969_v0 }
 0x26c   :  { %884 = vmatpush3.msra.mxu1 %v523_v24 }
 0x26d   :  { %885 = vmatprep.subr.mxu1 %v969_v0 }
 0x26e   :  { %886 = vmatpush3.msra.mxu1 %v522_v25 }
 0x26f   :  { %887 = vmatprep.subr.mxu1 %v969_v0 }
 0x270   :  { %888 = vmatpush3.msra.mxu1 %v521_v26 }
 0x271   :  { %889 = vmatprep.subr.mxu1 %v969_v0 }
 0x272   :  { %890 = vmatpush3.msra.mxu1 %v520_v27 }
 0x273   :  { %891 = vmatprep.subr.mxu1 %v969_v0 }
 0x274   :  { %892 = vmatpush3.msra.mxu1 %v519_v28 }
 0x275   :  { %893 = vmatprep.subr.mxu1 %v969_v0 }
 0x276   :  { %894 = vmatpush3.msra.mxu1 %v518_v29 }
 0x277   :  { %895 = vmatprep.subr.mxu1 %v969_v0 }
 0x278   :  { %896 = vmatpush3.msra.mxu1 %v517_v30 }
 0x279   :  { %897 = vmatprep.subr.mxu1 %v969_v0 }
 0x27a   :  { %898 = vmatpush3.msra.mxu1 %v516_v31 }
 0x27b   :  { %899 = vmatprep.subr.mxu1 %v969_v0 }
 0x27c   :  { %900 = vmatpush3.msra.mxu1 %v515_v32 }
 0x27d   :  { %901 = vmatprep.subr.mxu1 %v969_v0 }
 0x27e   :  { %902 = vmatpush3.msra.mxu1 %v514_v33 }
 0x27f   :  { %903 = vmatprep.subr.mxu1 %v969_v0 }
 0x280   :  { %904 = vmatpush3.msra.mxu1 %v513_v34 }
 0x281   :  { %905 = vmatprep.subr.mxu1 %v969_v0 }
 0x282   :  { %906 = vmatpush3.msra.mxu1 %v512_v40 }
 0x283   :  { %907 = vmatprep.subr.mxu1 %v969_v0 }
 0x284   :  { %908 = vmatpush3.msra.mxu1 %v511_v41 }
 0x285   :  { %909 = vmatprep.subr.mxu1 %v969_v0 }
 0x286   :  { %910 = vmatpush3.msra.mxu1 %v510_v42 }
 0x327   :  { %v409_v36 = vpop.f32.mrf.mxu1 }
 0x328   :  { %v410_v37 = vadd.f32 %v634_v35, %v409_v36 }
 0x329   :  { %v843_v38 = vpop.f32.mrf.mxu1 }
 0x32a   :  { %v413_v39 = vmax.f32 %v410_v37, 0.0 }
 0x32c   :  { %877 = vmatmul.mubr.f32.vlgmr.msra.gmra.mxu0 %v413_v39 }
 0x3ec   :  { %v505_v44 = vpop.f32.mrf.mxu0 }
 0x3ed   :  { %v506_v45 = vadd.f32 %v636_v43, %v505_v44 }
 0x3ee   :  { %v878_v46 = vpop.f32.mrf.mxu0 }
 0x3ef   :  { %v509_v47 = vmax.f32 %v506_v45, 0.0 }
 0x3f1   :  { %912 = vmatmul.mubr.f32.vlgmr.msra.gmra.mxu1 %v509_v47 }
 0x4b1   :  { %v599_v49 = vpop.f32.mrf.mxu1 }
 0x4b2   :  { %v600_v0 = vadd.f32 %v637_v48, %v599_v49 }
 0x4b3   :  { %v913_v50 = vpop.f32.mrf.mxu1 }
 0x4b4   :  { %v603_v51 = vmax.f32 %v600_v0, 0.0 }
 0x4b6   :  { %v604_v52 = vmul.f32 %v603_v51, %v603_v51 }
 0x4b8   :  { %v606_v53 = vsel %vm605_vm2, %v604_v52, 0.0 }
 0x4b9   :  { %607 = vadd.xlane.f32.xlu0 %v606_v53 }
 0x542   :  { %v608_v54 = vpop.xlane.xlu0 %607 }
 0x543   :  { %v609_v55 = vmax.f32 %v608_v54, 1e-16 }
 0x545   :  { %920 = vrsqrt.f32 %v609_v55 }
 0x552   :  { %v921_v56 = vpop.eup %920 }
 0x553   :  { %v611_v57 = vmul.f32 %v921_v56, %v603_v51 }
 0x555   :  { %612 = vst.msk [vmem:[#allocation5] sm:$0xff] %vm605_vm2, %v611_v57 }
 0x556   :  { %953 = shalt.err (!%p950_p9)
}
 0x557   :  { %622 = dma.vmem_to_hbm [thread:$0]  %s620_s5, 128, %s1202_s7, [#allocation4]  }
 0x558   :  { %964 = dma.done.wait [#allocation4], 128  }
 0x559   :  { %965 = vsyncadd [#allocation4], 4294967168 }
 0x55a   :  { %626 = vsyncpa [#allocation3], 1 }
 0x55b   :  { %627 = vsyncpa [#allocation4], 1 }

</bundles_post_ra>
